<compile_context>
chip_gen: v6e
topology: v6e:2x2x1
jax: 0.10.0
libtpu: 0.0.40
codegen_flags: <defaults>
</compile_context>

<pallas_src>
import functools

import jax
import jax.numpy as jnp
from jax import lax
from jax.experimental import pallas as pl
from jax.experimental.pallas import tpu as pltpu

EPS = 1e-5
F32 = jnp.float32


# --------------------------------------------------------------------------- #
# helpers
# --------------------------------------------------------------------------- #
def _cp(num_axes=1):
    return pltpu.CompilerParams(
        dimension_semantics=("parallel",) * num_axes,
        vmem_limit_bytes=32 * 1024 * 1024)


def _row_tile(P, target=256):
    """Largest row tile <= target that divides P (multiple of 8)."""
    for t in (target, 128, 64, 32, 16, 8):
        if t <= P and P % t == 0:
            return t
    return P


def _store_partial_stats(st_ref, y):
    """Per-tile [sum, sum-of-squares] over rows into a (1, 2, C) block."""
    st_ref[0, 0:1, :] = jnp.sum(y, axis=0, keepdims=True)
    st_ref[0, 1:2, :] = jnp.sum(y * y, axis=0, keepdims=True)


def _finalize_stats(partials, count):
    """(G, 2, C) partial sums -> per-channel mean and rsqrt(var+eps), each (1, C)."""
    tot = jnp.sum(partials, axis=0)
    mean = tot[0] / count
    var = tot[1] / count - mean * mean          # biased variance (training-mode BN)
    return mean[None, :], lax.rsqrt(var + EPS)[None, :]


def _bn_apply(y, mean_ref, inv_ref, gamma_ref, beta_ref):
    return (y - mean_ref[...]) * inv_ref[...] * gamma_ref[...] + beta_ref[...]


# --------------------------------------------------------------------------- #
# Pallas kernels
# --------------------------------------------------------------------------- #
def conv1_shortcut_kernel(x_ref, w1_ref, wsc_ref,
                          y1_ref, ysc_ref, st1_ref, stsc_ref):
    """conv1 (1x1) + shortcut conv (1x1) on one P-row tile + partial BN stats.
    Shortcut bias is omitted: it is cancelled by the following BN mean subtraction."""
    x = x_ref[...]
    y1 = jnp.dot(x, w1_ref[...], preferred_element_type=F32)
    ysc = jnp.dot(x, wsc_ref[...], preferred_element_type=F32)
    y1_ref[...] = y1
    ysc_ref[...] = ysc
    _store_partial_stats(st1_ref, y1)
    _store_partial_stats(stsc_ref, ysc)


def qkv_proj_kernel(y1_ref, m1_ref, i1_ref, g1_ref, b1_ref, wqkv_ref, bqkv_ref,
                    q_ref, k_ref, v_ref):
    """bn1(train)+relu fused with the q/k/v 1x1 projections (single fat matmul)."""
    hn = jnp.maximum(_bn_apply(y1_ref[...], m1_ref, i1_ref, g1_ref, b1_ref), 0.0)
    qkv = jnp.dot(hn, wqkv_ref[...], preferred_element_type=F32) + bqkv_ref[...]
    C = q_ref.shape[-1]
    q_ref[...] = qkv[:, 0:C]
    k_ref[...] = qkv[:, C:2 * C]
    v_ref[...] = qkv[:, 2 * C:3 * C]


def mhsa_attn_kernel(q_ref, k_ref, v_ref, pos_ref, o_ref, st_ref, *, heads):
    """All heads of one batch element on lane-dense (L, C) blocks; heads are a
    small static loop inside the kernel. Also emits partial bn2 statistics."""
    L, C = q_ref.shape
    d = C // heads
    q = q_ref[...]
    k = k_ref[...]
    v = v_ref[...]
    pos = pos_ref[...]
    nt = (((1,), (1,)), ((), ()))               # contract last dims (A @ B^T)
    outs = []
    for h in range(heads):
        sl = slice(h * d, (h + 1) * d)
        qh, kh, vh, ph = q[:, sl], k[:, sl], v[:, sl], pos[:, sl]
        cc = lax.dot_general(qh, kh, nt, preferred_element_type=F32)
        cp = lax.dot_general(ph, qh, nt, preferred_element_type=F32)
        e = cc + cp
        e = e - jnp.max(e, axis=-1, keepdims=True)
        p = jnp.exp(e)
        s = jnp.sum(p, axis=-1, keepdims=True)
        r = pl.reciprocal(s, approx=True)
        r = r * (2.0 - s * r)                   # one Newton step -> f32 accuracy, still EUP
        outs.append(jnp.dot(p * r, vh, preferred_element_type=F32))
    out = jnp.concatenate(outs, axis=1)         # merged-head channel = h*d + dd
    o_ref[...] = out
    _store_partial_stats(st_ref, out)


def conv3x3_bn1_kernel(y1p_ref, w2_ref, m1_ref, i1_ref, g1_ref, b1_ref,
                       o_ref, st_ref):
    """bn1(train)+relu fused with a 3x3 stride-1 conv for one batch element.
    Input is the spatially zero-padded pre-BN conv1 output; the pad ring is
    re-zeroed after normalisation with an iota mask. No im2col is materialised:
    nine shifted matmuls are accumulated in VMEM. Emits partial bn2 stats."""
    _, D2p, D3p, Cin = y1p_ref.shape
    D2, D3 = D2p - 2, D3p - 2
    Cout = w2_ref.shape[-1]
    hn = jnp.maximum(_bn_apply(y1p_ref[0], m1_ref, i1_ref, g1_ref, b1_ref), 0.0)
    ri = lax.broadcasted_iota(jnp.int32, (D2p, D3p), 0)
    ci = lax.broadcasted_iota(jnp.int32, (D2p, D3p), 1)
    inside = ((ri >= 1) & (ri <= D2) & (ci >= 1) & (ci <= D3)).astype(F32)
    hn = hn * inside[:, :, None]
    w2 = w2_ref[...]                            # (3, 3, Cin, Cout)
    acc = jnp.zeros((D2 * D3, Cout), F32)
    for dy in range(3):
        for dx in range(3):
            win = hn[dy:dy + D2, dx:dx + D3, :].reshape(D2 * D3, Cin)
            acc = acc + jnp.dot(win, w2[dy, dx], preferred_element_type=F32)
    o_ref[0] = acc.reshape(D2, D3, Cout)
    _store_partial_stats(st_ref, acc)


def conv3_bn2_kernel(h2_ref, m2_ref, i2_ref, g2_ref, b2_ref, w3_ref,
                     y3_ref, st_ref):
    """bn2(train)+relu fused with the 1x1 conv3 on one P-row tile + bn3 partials."""
    hn = jnp.maximum(_bn_apply(h2_ref[...], m2_ref, i2_ref, g2_ref, b2_ref), 0.0)
    y3 = jnp.dot(hn, w3_ref[...], preferred_element_type=F32)
    y3_ref[...] = y3
    _store_partial_stats(st_ref, y3)


def residual_out_kernel(y3_ref, ysc_ref, m3_ref, i3_ref, g3_ref, b3_ref,
                        msc_ref, isc_ref, gsc_ref, bsc_ref, o_ref):
    """bn3 + shortcut-bn + residual add + relu on one P-row tile."""
    main = _bn_apply(y3_ref[...], m3_ref, i3_ref, g3_ref, b3_ref)
    sc = _bn_apply(ysc_ref[...], msc_ref, isc_ref, gsc_ref, bsc_ref)
    o_ref[...] = jnp.maximum(main + sc, 0.0)


# --------------------------------------------------------------------------- #
# Pallas-backed forward (glue = layout / tiny per-channel stat finalisation)
# --------------------------------------------------------------------------- #
def bottleneck_forward(x_nchw, params, *, heads, mhsa, row_tile=256):
    N, Cin, D2, D3 = x_nchw.shape
    P = N * D2 * D3
    L = D2 * D3
    planes = params['w1'].shape[0]
    exp = params['w3'].shape[0]
    x2d = jnp.transpose(x_nchw, (0, 2, 3, 1)).reshape(P, Cin).astype(F32)

    tp = _row_tile(P, row_tile)
    G = P // tp

    row = lambda C: pl.BlockSpec((tp, C), lambda i: (i, 0))
    stat = lambda C: pl.BlockSpec((1, 2, C), lambda i: (i, 0, 0))
    vec = lambda C: pl.BlockSpec((1, C), lambda *_: (0, 0))
    full = lambda a: pl.BlockSpec(a.shape, lambda *_, nd=a.ndim: (0,) * nd)

    # ---- stage 1: conv1 + shortcut conv (x read once), tiled over P ----------
    w1t = params['w1'].T
    wsct = params['wsc'].T
    y1, ysc, st1, stsc = pl.pallas_call(
        conv1_shortcut_kernel,
        grid=(G,),
        in_specs=[row(Cin), full(w1t), full(wsct)],
        out_specs=[row(planes), row(exp), stat(planes), stat(exp)],
        out_shape=(jax.ShapeDtypeStruct((P, planes), F32),
                   jax.ShapeDtypeStruct((P, exp), F32),
                   jax.ShapeDtypeStruct((G, 2, planes), F32),
                   jax.ShapeDtypeStruct((G, 2, exp), F32)),
        compiler_params=_cp(),
    )(x2d, w1t, wsct)
    m1, i1 = _finalize_stats(st1, P)
    msc, isc = _finalize_stats(stsc, P)
    g1 = params['g1'][None, :]
    b1 = params['b1'][None, :]

    # ---- stage 2: conv2 = MHSA or 3x3 conv (bn1+relu fused in) ---------------
    if mhsa:
        C = planes
        d = C // heads
        wqkv = jnp.concatenate([params['wq'].T, params['wk'].T, params['wv'].T], axis=1)
        bqkv = jnp.concatenate([params['bq'], params['bk'], params['bv']])[None, :]
        q, k, v = pl.pallas_call(
            qkv_proj_kernel,
            grid=(G,),
            in_specs=[row(planes), vec(planes), vec(planes), vec(planes), vec(planes),
                      full(wqkv), full(bqkv)],
            out_specs=[row(C), row(C), row(C)],
            out_shape=tuple(jax.ShapeDtypeStruct((P, C), F32) for _ in range(3)),
            compiler_params=_cp(),
        )(y1, m1, i1, g1, b1, wqkv, bqkv)
        # relative-position term laid out as (L, C) with channel = head*d + dd
        pos = (params['rel_h'] + params['rel_w']).reshape(heads, d, L)
        pos2d = jnp.transpose(pos, (2, 0, 1)).reshape(L, C)
        seq = lambda idx: pl.BlockSpec((L, C), idx)
        h2, st2 = pl.pallas_call(
            functools.partial(mhsa_attn_kernel, heads=heads),
            grid=(N,),
            in_specs=[seq(lambda n: (n, 0))] * 3 + [seq(lambda n: (0, 0))],
            out_specs=[seq(lambda n: (n, 0)),
                       pl.BlockSpec((1, 2, C), lambda n: (n, 0, 0))],
            out_shape=(jax.ShapeDtypeStruct((P, C), F32),
                       jax.ShapeDtypeStruct((N, 2, C), F32)),
            compiler_params=_cp(),
        )(q, k, v, pos2d)
        # TODO(synk): stride=2 variant (AvgPool2d(2,2) after MHSA) not wired up.
    else:
        # spatial zero-pad in glue (layout only, ~13% extra rows, not 9x im2col)
        y1p = jnp.pad(y1.reshape(N, D2, D3, planes),
                      ((0, 0), (1, 1), (1, 1), (0, 0)))
        w2r = jnp.transpose(params['w2'], (2, 3, 1, 0))       # (3, 3, Cin, Cout)
        h2_4d, st2 = pl.pallas_call(
            conv3x3_bn1_kernel,
            grid=(N,),
            in_specs=[pl.BlockSpec((1, D2 + 2, D3 + 2, planes),
                                   lambda n: (n, 0, 0, 0)),
                      full(w2r), vec(planes), vec(planes), vec(planes), vec(planes)],
            out_specs=[pl.BlockSpec((1, D2, D3, planes), lambda n: (n, 0, 0, 0)),
                       pl.BlockSpec((1, 2, planes), lambda n: (n, 0, 0))],
            out_shape=(jax.ShapeDtypeStruct((N, D2, D3, planes), F32),
                       jax.ShapeDtypeStruct((N, 2, planes), F32)),
            compiler_params=_cp(),
        )(y1p, w2r, m1, i1, g1, b1)
        h2 = h2_4d.reshape(P, planes)
        # TODO(synk): stride=2 variant (strided 3x3 conv) not wired up.
    m2, i2 = _finalize_stats(st2, P)

    # ---- stage 3: bn2+relu + conv3, tiled over P, emits bn3 partials ---------
    w3t = params['w3'].T
    y3, st3 = pl.pallas_call(
        conv3_bn2_kernel,
        grid=(G,),
        in_specs=[row(planes), vec(planes), vec(planes), vec(planes), vec(planes),
                  full(w3t)],
        out_specs=[row(exp), stat(exp)],
        out_shape=(jax.ShapeDtypeStruct((P, exp), F32),
                   jax.ShapeDtypeStruct((G, 2, exp), F32)),
        compiler_params=_cp(),
    )(h2, m2, i2, params['g2'][None, :], params['b2'][None, :], w3t)
    m3, i3 = _finalize_stats(st3, P)

    # ---- stage 4: bn3 + shortcut-bn + add + relu, tiled over P ---------------
    out2d = pl.pallas_call(
        residual_out_kernel,
        grid=(G,),
        in_specs=[row(exp), row(exp)] + [vec(exp)] * 8,
        out_specs=row(exp),
        out_shape=jax.ShapeDtypeStruct((P, exp), F32),
        compiler_params=_cp(),
    )(y3, ysc, m3, i3, params['g3'][None, :], params['b3'][None, :],
      msc, isc, params['gsc'][None, :], params['bsc_bn'][None, :])
    return out2d.reshape(N, D2, D3, exp).transpose(0, 3, 1, 2)


# --------------------------------------------------------------------------- #
# Deterministic parameter init (PyTorch weight layouts)
# --------------------------------------------------------------------------- #
def init_params(key, in_planes, planes, heads, resolution):
    exp = 4 * planes
    d = planes // heads
    Wr, Hr = resolution
    ks = jax.random.split(key, 21)
    w = lambda k, s: 0.2 * jax.random.normal(k, s, F32)
    g = lambda k, s: 1.0 + 0.1 * jax.random.normal(k, s, F32)
    b = lambda k, s: 0.1 * jax.random.normal(k, s, F32)
    return dict(
        w1=w(ks[0], (planes, in_planes)),                      # conv1 (O, I)
        g1=g(ks[1], (planes,)), b1=b(ks[2], (planes,)),
        w2=w(ks[3], (planes, planes, 3, 3)),                   # conv2 3x3 (O, I, kH, kW)
        wq=w(ks[4], (planes, planes)), bq=b(ks[5], (planes,)),
        wk=w(ks[6], (planes, planes)), bk=b(ks[7], (planes,)),
        wv=w(ks[8], (planes, planes)), bv=b(ks[9], (planes,)),
        rel_h=jax.random.normal(ks[10], (1, heads, d, 1, Hr), F32),
        rel_w=jax.random.normal(ks[11], (1, heads, d, Wr, 1), F32),
        g2=g(ks[12], (planes,)), b2=b(ks[13], (planes,)),
        w3=w(ks[14], (exp, planes)),                           # conv3 (O, I)
        g3=g(ks[15], (exp,)), b3=b(ks[16], (exp,)),
        wsc=w(ks[17], (exp, in_planes)), bsc=b(ks[18], (exp,)),  # shortcut conv (+bias)
        gsc=g(ks[19], (exp,)), bsc_bn=b(ks[20], (exp,)),
    )


# --------------------------------------------------------------------------- #
# Pure-JAX reference (direct translation of the PyTorch forward, NCHW)
# --------------------------------------------------------------------------- #
def _conv1x1_ref(x, w, bias=None):
    y = jnp.einsum('ncij,oc->noij', x, w)
    if bias is not None:
        y = y + bias[None, :, None, None]
    return y


def _bn_ref(x, gamma, beta):
    mean = jnp.mean(x, axis=(0, 2, 3), keepdims=True)
    var = jnp.mean((x - mean) ** 2, axis=(0, 2, 3), keepdims=True)
    return (x - mean) / jnp.sqrt(var + EPS) * gamma[None, :, None, None] \
        + beta[None, :, None, None]


def _mhsa_ref(x, params, heads):
    n, C, Wd, Hd = x.shape
    d = C // heads
    q = _conv1x1_ref(x, params['wq'], params['bq']).reshape(n, heads, d, -1)
    k = _conv1x1_ref(x, params['wk'], params['bk']).reshape(n, heads, d, -1)
    v = _conv1x1_ref(x, params['wv'], params['bv']).reshape(n, heads, d, -1)
    cc = jnp.einsum('nhdi,nhdj->nhij', q, k)
    pos = (params['rel_h'] + params['rel_w']).reshape(1, heads, d, -1)
    cp = jnp.einsum('hdi,nhdj->nhij', pos[0], q)
    att = jax.nn.softmax(cc + cp, axis=-1)
    out = jnp.einsum('nhdj,nhij->nhdi', v, att)
    return out.reshape(n, C, Wd, Hd)


def bottleneck_ref(x, params, *, heads, mhsa):
    out = jax.nn.relu(_bn_ref(_conv1x1_ref(x, params['w1']), params['g1'], params['b1']))
    if mhsa:
        out = _mhsa_ref(out, params, heads)
    else:
        out = lax.conv_general_dilated(out, params['w2'], (1, 1), ((1, 1), (1, 1)),
                                       dimension_numbers=('NCHW', 'OIHW', 'NCHW'))
    out = jax.nn.relu(_bn_ref(out, params['g2'], params['b2']))
    out = _bn_ref(_conv1x1_ref(out, params['w3']), params['g3'], params['b3'])
    sc = _bn_ref(_conv1x1_ref(x, params['wsc'], params['bsc']),   # bias kept in ref:
                 params['gsc'], params['bsc_bn'])                 # BN cancels it exactly
    return jax.nn.relu(out + sc)


# --------------------------------------------------------------------------- #
if __name__ == "__main__":
    N, in_planes, D2, D3 = 2, 4, 16, 16        # x: (N, C, width, height), NCHW
    planes, heads = 8, 4                        # expansion*planes = 32 -> shortcut active
    key = jax.random.PRNGKey(0)
    kx, kp = jax.random.split(key)
    x = jax.random.normal(kx, (N, in_planes, D2, D3), F32)
    params = init_params(kp, in_planes, planes, heads, (D2, D3))

    for use_mhsa in (True, False):
        out = bottleneck_forward(x, params, heads=heads, mhsa=use_mhsa)
        out = jax.block_until_ready(out)
        ref = bottleneck_ref(x, params, heads=heads, mhsa=use_mhsa)
        assert out.shape == (N, 4 * planes, D2, D3), out.shape
        assert bool(jnp.allclose(out, ref, atol=2e-2, rtol=2e-2)), \
            f"mismatch (mhsa={use_mhsa}): max|d|={float(jnp.max(jnp.abs(out - ref)))}"
    print("KERNEL_OK")
</pallas_src>

<mosaic_0001>
module attributes {stable_mosaic.version = 11 : i64} {
  func.func @conv1_shortcut_kernel(%arg0: i32, %arg1: memref<256x4xf32, #tpu.memory_space<vmem>>, %arg2: memref<4x8xf32, #tpu.memory_space<vmem>>, %arg3: memref<4x32xf32, #tpu.memory_space<vmem>>, %arg4: memref<256x8xf32, #tpu.memory_space<vmem>>, %arg5: memref<256x32xf32, #tpu.memory_space<vmem>>, %arg6: memref<1x2x8xf32, #tpu.memory_space<vmem>>, %arg7: memref<1x2x32xf32, #tpu.memory_space<vmem>>) attributes {dimension_semantics = [#tpu.dimension_semantics<parallel>], iteration_bounds = array<i64: 2>, scalar_prefetch = 0 : i64, scratch_operands = 0 : i64, tpu.core_type = #tpu.core_type<tc>, window_params = [{transform_indices = @transform_0, window_bounds = array<i64: 256, 4>}, {pipeline_mode = #tpu.pipeline_mode<synchronous>, transform_indices = @transform_1, window_bounds = array<i64: 4, 8>}, {pipeline_mode = #tpu.pipeline_mode<synchronous>, transform_indices = @transform_2, window_bounds = array<i64: 4, 32>}, {transform_indices = @transform_3, window_bounds = array<i64: 256, 8>}, {transform_indices = @transform_4, window_bounds = array<i64: 256, 32>}, {transform_indices = @transform_5, window_bounds = array<i64: 1, 2, 8>}, {transform_indices = @transform_6, window_bounds = array<i64: 1, 2, 32>}]} {
    %c0 = arith.constant 0 : index
    %c0_0 = arith.constant 0 : index
    %0 = vector.load %arg1[%c0, %c0_0] : memref<256x4xf32, #tpu.memory_space<vmem>>, vector<256x4xf32>
    %c0_1 = arith.constant 0 : index
    %c0_2 = arith.constant 0 : index
    %1 = vector.load %arg2[%c0_1, %c0_2] : memref<4x8xf32, #tpu.memory_space<vmem>>, vector<4x8xf32>
    %cst = arith.constant dense<0.000000e+00> : vector<256x8xf32>
    %2 = tpu.matmul %0, %1, %cst {dimension_numbers = #tpu.dot_dimension_numbers<[1], [0], [0], [1], [0, 0, 1, 1], [], []>} : vector<256x4xf32>, vector<4x8xf32>, vector<256x8xf32> -> vector<256x8xf32>
    %c0_3 = arith.constant 0 : index
    %c0_4 = arith.constant 0 : index
    %3 = vector.load %arg3[%c0_3, %c0_4] : memref<4x32xf32, #tpu.memory_space<vmem>>, vector<4x32xf32>
    %cst_5 = arith.constant dense<0.000000e+00> : vector<256x32xf32>
    %4 = tpu.matmul %0, %3, %cst_5 {dimension_numbers = #tpu.dot_dimension_numbers<[1], [0], [0], [1], [0, 0, 1, 1], [], []>} : vector<256x4xf32>, vector<4x32xf32>, vector<256x32xf32> -> vector<256x32xf32>
    %c0_6 = arith.constant 0 : index
    %c0_7 = arith.constant 0 : index
    %5 = vector.load %arg4[%c0_6, %c0_7] : memref<256x8xf32, #tpu.memory_space<vmem>>, vector<256x8xf32>
    tpu.vector_store %arg4[%c0_6, %c0_7], %2 {strides = array<i32>} : memref<256x8xf32, #tpu.memory_space<vmem>>, vector<256x8xf32>,
    %c0_8 = arith.constant 0 : index
    %c0_9 = arith.constant 0 : index
    %6 = vector.load %arg5[%c0_8, %c0_9] : memref<256x32xf32, #tpu.memory_space<vmem>>, vector<256x32xf32>
    tpu.vector_store %arg5[%c0_8, %c0_9], %4 {strides = array<i32>} : memref<256x32xf32, #tpu.memory_space<vmem>>, vector<256x32xf32>,
    %cst_10 = arith.constant dense<0.000000e+00> : vector<8xf32>
    %7 = vector.multi_reduction <add>, %2, %cst_10 [0] : vector<256x8xf32> to vector<8xf32>
    %8 = vector.shape_cast %7 : vector<8xf32> to vector<1x8xf32>
    %c0_11 = arith.constant 0 : index
    %c0_12 = arith.constant 0 : index
    %c0_13 = arith.constant 0 : index
    %9 = vector.load %arg6[%c0_11, %c0_12, %c0_13] : memref<1x2x8xf32, #tpu.memory_space<vmem>>, vector<1x1x8xf32>
    %10 = vector.shape_cast %9 : vector<1x1x8xf32> to vector<1x8xf32>
    %11 = vector.shape_cast %8 : vector<1x8xf32> to vector<1x1x8xf32>
    tpu.vector_store %arg6[%c0_11, %c0_12, %c0_13], %11 {strides = array<i32>} : memref<1x2x8xf32, #tpu.memory_space<vmem>>, vector<1x1x8xf32>,
    %12 = arith.mulf %2, %2 : vector<256x8xf32>
    %cst_14 = arith.constant dense<0.000000e+00> : vector<8xf32>
    %13 = vector.multi_reduction <add>, %12, %cst_14 [0] : vector<256x8xf32> to vector<8xf32>
    %14 = vector.shape_cast %13 : vector<8xf32> to vector<1x8xf32>
    %c0_15 = arith.constant 0 : index
    %c1 = arith.constant 1 : index
    %c0_16 = arith.constant 0 : index
    %15 = vector.load %arg6[%c0_15, %c1, %c0_16] : memref<1x2x8xf32, #tpu.memory_space<vmem>>, vector<1x1x8xf32>
    %16 = vector.shape_cast %15 : vector<1x1x8xf32> to vector<1x8xf32>
    %17 = vector.shape_cast %14 : vector<1x8xf32> to vector<1x1x8xf32>
    tpu.vector_store %arg6[%c0_15, %c1, %c0_16], %17 {strides = array<i32>} : memref<1x2x8xf32, #tpu.memory_space<vmem>>, vector<1x1x8xf32>,
    %cst_17 = arith.constant dense<0.000000e+00> : vector<32xf32>
    %18 = vector.multi_reduction <add>, %4, %cst_17 [0] : vector<256x32xf32> to vector<32xf32>
    %19 = vector.shape_cast %18 : vector<32xf32> to vector<1x32xf32>
    %c0_18 = arith.constant 0 : index
    %c0_19 = arith.constant 0 : index
    %c0_20 = arith.constant 0 : index
    %20 = vector.load %arg7[%c0_18, %c0_19, %c0_20] : memref<1x2x32xf32, #tpu.memory_space<vmem>>, vector<1x1x32xf32>
    %21 = vector.shape_cast %20 : vector<1x1x32xf32> to vector<1x32xf32>
    %22 = vector.shape_cast %19 : vector<1x32xf32> to vector<1x1x32xf32>
    tpu.vector_store %arg7[%c0_18, %c0_19, %c0_20], %22 {strides = array<i32>} : memref<1x2x32xf32, #tpu.memory_space<vmem>>, vector<1x1x32xf32>,
    %23 = arith.mulf %4, %4 : vector<256x32xf32>
    %cst_21 = arith.constant dense<0.000000e+00> : vector<32xf32>
    %24 = vector.multi_reduction <add>, %23, %cst_21 [0] : vector<256x32xf32> to vector<32xf32>
    %25 = vector.shape_cast %24 : vector<32xf32> to vector<1x32xf32>
    %c0_22 = arith.constant 0 : index
    %c1_23 = arith.constant 1 : index
    %c0_24 = arith.constant 0 : index
    %26 = vector.load %arg7[%c0_22, %c1_23, %c0_24] : memref<1x2x32xf32, #tpu.memory_space<vmem>>, vector<1x1x32xf32>
    %27 = vector.shape_cast %26 : vector<1x1x32xf32> to vector<1x32xf32>
    %28 = vector.shape_cast %25 : vector<1x32xf32> to vector<1x1x32xf32>
    tpu.vector_store %arg7[%c0_22, %c1_23, %c0_24], %28 {strides = array<i32>} : memref<1x2x32xf32, #tpu.memory_space<vmem>>, vector<1x1x32xf32>,
    return
  }
  func.func @transform_0(%arg0: i32) -> (i32, i32) {
    %c0_i32 = arith.constant 0 : i32
    %c0_i32_0 = arith.constant 0 : i32
    return %arg0, %c0_i32 : i32, i32
  }
  func.func @transform_1(%arg0: i32) -> (i32, i32) {
    %c0_i32 = arith.constant 0 : i32
    %c0_i32_0 = arith.constant 0 : i32
    %c0_i32_1 = arith.constant 0 : i32
    return %c0_i32, %c0_i32_0 : i32, i32
  }
  func.func @transform_2(%arg0: i32) -> (i32, i32) {
    %c0_i32 = arith.constant 0 : i32
    %c0_i32_0 = arith.constant 0 : i32
    %c0_i32_1 = arith.constant 0 : i32
    return %c0_i32, %c0_i32_0 : i32, i32
  }
  func.func @transform_3(%arg0: i32) -> (i32, i32) {
    %c0_i32 = arith.constant 0 : i32
    %c0_i32_0 = arith.constant 0 : i32
    return %arg0, %c0_i32 : i32, i32
  }
  func.func @transform_4(%arg0: i32) -> (i32, i32) {
    %c0_i32 = arith.constant 0 : i32
    %c0_i32_0 = arith.constant 0 : i32
    return %arg0, %c0_i32 : i32, i32
  }
  func.func @transform_5(%arg0: i32) -> (i32, i32, i32) {
    %c0_i32 = arith.constant 0 : i32
    %c0_i32_0 = arith.constant 0 : i32
    %c0_i32_1 = arith.constant 0 : i32
    return %arg0, %c0_i32, %c0_i32_0 : i32, i32, i32
  }
  func.func @transform_6(%arg0: i32) -> (i32, i32, i32) {
    %c0_i32 = arith.constant 0 : i32
    %c0_i32_0 = arith.constant 0 : i32
    %c0_i32_1 = arith.constant 0 : i32
    return %arg0, %c0_i32, %c0_i32_0 : i32, i32, i32
  }
}

</mosaic_0001>

<bundles_post_ra>
// kernel: tpu_custom_call.1
= control target key start
LH: loop header
LB: loop body
LE: loop exit
PB: predicated region body
PF: predicated region fallthrough
CT: control target
= control target key end

     0   :  { %12 = vsyncpa [#allocation3], 0  ;;  %s2568_s0 = inlined_call_operand.vmem [shape: f32[512,4], index: 0, kind: input, shape index: {}]   ;;  %s2569_s1 = inlined_call_operand.vmem [shape: f32[4,8], index: 1, kind: input, shape index: {}]   ;;  %s2570_s2 = inlined_call_operand.vmem [shape: f32[4,32], index: 2, kind: input, shape index: {}]   ;;  %s2571_s3 = inlined_call_operand.vmem [shape: f32[512,8], index: 3, kind: output, shape index: {0}]   ;;  %s2572_s4 = inlined_call_operand.vmem [shape: f32[512,32], index: 4, kind: output, shape index: {1}]   ;;  %s2573_s5 = inlined_call_operand.hbm [shape: f32[2,2,8], index: 5, kind: output, shape index: {2}]   ;;  %s2574_s6 = inlined_call_operand.hbm [shape: f32[2,2,32], index: 6, kind: output, shape index: {3}]  }
   0x1   :  { %14 = vsyncpa [#allocation3 + $0x1], 0 }
   0x2   :  { %15 = vsyncpa [#allocation5], 0 }
   0x3   :  { %17 = vsyncpa [#allocation5 + $0x1], 0  ;;  %s1903_s21 = smov 0   ;;  %s1905_s22 = smov 0  }
   0x4   :  { %s1907_s23 = smov 0   ;;  %s1909_s24 = smov 0  }
   0x5 LB: > { %s1479_s25 = sadd.s32 4294967295, %s1864_s24   ;;  %s1480_s26 = sadd.s32 4294967294, %s1864_s24   ;;  %s1864_s24 = sphi %s1909_s24, %s2580_s24   ;;  %s1860_s23 = sphi %s1907_s23, %s2579_s23   ;;  %s1856_s22 = sphi %s1905_s22, %s2578_s22   ;;  %s1852_s21 = sphi %s1903_s21, %s2577_s21  }
   0x6   : > { %s1926_s27 = sadd.s32 1, %s1864_s24   ;;  %s150_s28 = sadd.s32 1, %s1860_s23 }
   0x7   : > { %s147_s29 = ssub.s32 %s1864_s24, %s1926_s27  ;;  %p160_p0 = scmp.ne.s32.totalorder %s1860_s23, %s1856_s22 }
   0x8   : > { %p148_p1 = scmp.eq.s32.totalorder %s147_s29, 0  ;;  %p161_p2 = scmp.eq.s32.totalorder %s1479_s25, 1 }
   0x9   : > { %p166_p3 = scmp.ne.s32.totalorder %s1856_s22, %s1852_s21  ;;  %p167_p4 = scmp.eq.s32.totalorder %s1480_s26, 1 }
   0xa   : > { %s1936_s30 = scalar_select %p148_p1, %s1860_s23, %s150_s28  }
   0xb   : > { %p1938_p5 = por %p161_p2, %p160_p0  ;;  %p1942_p6 = por %p167_p4, %p166_p3 }
   0xc   : > { %p1483_p7 = scmp.ge.s32.totalorder %s1864_s24, 1  ;;  %p226_p8 = scmp.lt.s32.totalorder %s1864_s24, 3 }
   0xe   : > { %p227_p9 = pnand %p1483_p7, %p226_p8 }
   0xf   : > { %s1954_s13 = sshll.u32 (!%p227_p9), %s1479_s25, 5  ;;  %s2481_s9 = sand.u32 (!%p227_p9), 1, %s1856_s22  }
  0x10   : > { %230 = sbr.rel (%p227_p9) target bundleno = 349 (0x15d), region = 32  ;;  %p272_p10 = scmp.lt.s32.totalorder (!%p227_p9), %s1954_s13, 63 }
  0x11   : > { %s1484_s10 = sshll.u32 (!%p227_p9), %s2481_s9, 1  ;;  %s1300_s26 = scalar_lea.sflag (!%p227_p9), [#allocation3], %s2481_s9 }
  0x12   : > { %s263_s11 = scalar_lea.vmem (!%p227_p9), [#allocation2], %s1484_s10 }
  0x13   : > { %s1326_s12 = sshll.u32 (!%p227_p9), %s263_s11, 4  ;;  %s2494_s12 = int_to_ptr.vmem [resolvable:$true] %s1326_s12 }
  0x14   : > { %s1774_s28 = scalar_lea.vmem (!%p227_p9), %s2494_s12, 32 }
  0x15   : > { %v321_v0 = vld [vmem:[%s2569_s1] sm:$0xf]  ;;  %vm419_vm0 = vcmask 1043456   ;;  %s273_s14 = scalar_select %p272_p10, %s1954_s13, 63  ;;  %vm322_vm1 = vcmask 31744   ;;  %vm877_vm2 = vcmask 64512  }
  0x16   : > { %v648_v1 = vld [vmem:[%s2570_s2] sm:$0xf]  ;;  %1630 = vmatprep.subr.msk.mxu0 %vm419_vm0, %v321_v0  ;;  %vm910_vm3 = vcmask 261120   ;;  %vm1012_vm4 = vcmask 57344   ;;  %vm1185_vm5 = vcmask 253952   ;;  %p1775_p11 = scmp.ne.s32.totalorder %s2494_s12, %s1774_s28 }
  0x17   : > { %1680 = vmatprep.subr.msk.mxu1 %vm419_vm0, %v648_v1  ;;  %1631 = vmatpush3.msk.msra.mxu0 %vm419_vm0, %v321_v0  ;;  %s1958_s15 = sshll.u32 %s273_s14, 3  ;;  %s2484_s14 = scalar_lea.vmem [#allocation4], %s1484_s10 }
  0x18   : > { %1681 = vmatpush3.msk.msra.mxu1 %vm419_vm0, %v648_v1  ;;  %s1964_s18 = scalar_lea.vmem %s2568_s0, %s1958_s15  ;;  %s2066_s25 = scalar_lea.vmem %s2571_s3, %s1958_s15 }
  0x19   : > { %v289_v2 = vld [vmem:[%s1964_s18] sm:$0xff]  ;;  %v290_v3 = vld [vmem:[%s1964_s18 + $0x8] sm:$0xff]  ;;  %v291_v4 = vld [vmem:[%s1964_s18 + $0x10] sm:$0xff]  ;;  %s2072_s29 = scalar_lea.vmem %s2572_s4, %s1958_s15  ;;  %s1339_s15 = sshll.u32 %s2484_s14, 4  ;;  %s2504_s15 = int_to_ptr.vmem [resolvable:$true] %s1339_s15 }
  0x1a   : > { %1632 = vmatprep.mubr.msk.f32.mxu0 %vm322_vm1, %v289_v2  ;;  %1682 = vmatprep.mubr.msk.f32.mxu1 %vm322_vm1, %v289_v2  ;;  %v292_v5 = vld [vmem:[%s1964_s18 + $0x18] sm:$0xff]  ;;  %v293_v6 = vld [vmem:[%s1964_s18 + $0x20] sm:$0xff]  ;;  %v294_v7 = vld [vmem:[%s1964_s18 + $0x28] sm:$0xff]  ;;  %p1776_p12 = pnand %p1775_p11, %p1938_p5 }
  0x1b   : > { %1633 = vmatmul.mubr.msk.f32.vlgmr.msra.gmra.mxu0 %vm322_vm1, %v290_v3  ;;  %1683 = vmatmul.mubr.msk.f32.vlgmr.msra.gmra.mxu1 %vm322_vm1, %v290_v3  ;;  %v295_v8 = vld [vmem:[%s1964_s18 + $0x30] sm:$0xff]  ;;  %v296_v9 = vld [vmem:[%s1964_s18 + $0x38] sm:$0xff]  ;;  %v297_v10 = vld [vmem:[%s1964_s18 + $0x40] sm:$0xff] }
  0x1c   : > { %1635 = vmatprep.mubr.msk.f32.mxu0 %vm322_vm1, %v291_v4  ;;  %1685 = vmatprep.mubr.msk.f32.mxu1 %vm322_vm1, %v291_v4  ;;  %v298_v11 = vld [vmem:[%s1964_s18 + $0x48] sm:$0xff]  ;;  %v299_v12 = vld [vmem:[%s1964_s18 + $0x50] sm:$0xff]  ;;  %v300_v13 = vld [vmem:[%s1964_s18 + $0x58] sm:$0xff]  ;;  %p1777_p13 = pneg %p1776_p12 }
  0x1d   : > { %v301_v14 = vld [vmem:[%s1964_s18 + $0x60] sm:$0xff]  ;;  %v302_v15 = vld [vmem:[%s1964_s18 + $0x68] sm:$0xff]  ;;  %v303_v16 = vld [vmem:[%s1964_s18 + $0x70] sm:$0xff] }
  0x1e   : > { %v304_v17 = vld [vmem:[%s1964_s18 + $0x78] sm:$0xff]  ;;  %v305_v18 = vld [vmem:[%s1964_s18 + $0x80] sm:$0xff]  ;;  %v306_v19 = vld [vmem:[%s1964_s18 + $0x88] sm:$0xff] }
  0x1f   : > { %1636 = vmatmul.mubr.msk.f32.gmra.mxu0 %vm322_vm1, %v292_v5  ;;  %1686 = vmatmul.mubr.msk.f32.gmra.mxu1 %vm322_vm1, %v292_v5  ;;  %v307_v20 = vld [vmem:[%s1964_s18 + $0x90] sm:$0xff]  ;;  %v308_v21 = vld [vmem:[%s1964_s18 + $0x98] sm:$0xff]  ;;  %v309_v22 = vld [vmem:[%s1964_s18 + $0xa0] sm:$0xff] }
  0x20   : > { %1638 = vmatprep.mubr.msk.f32.mxu0 %vm322_vm1, %v293_v6  ;;  %1688 = vmatprep.mubr.msk.f32.mxu1 %vm322_vm1, %v293_v6  ;;  %v310_v23 = vld [vmem:[%s1964_s18 + $0xa8] sm:$0xff]  ;;  %v311_v24 = vld [vmem:[%s1964_s18 + $0xb0] sm:$0xff]  ;;  %v312_v25 = vld [vmem:[%s1964_s18 + $0xb8] sm:$0xff] }
  0x21   : > { %v313_v26 = vld [vmem:[%s1964_s18 + $0xc0] sm:$0xff]  ;;  %v314_v27 = vld [vmem:[%s1964_s18 + $0xc8] sm:$0xff]  ;;  %v315_v28 = vld [vmem:[%s1964_s18 + $0xd0] sm:$0xff] }
  0x22   : > { %v316_v29 = vld [vmem:[%s1964_s18 + $0xd8] sm:$0xff]  ;;  %v317_v30 = vld [vmem:[%s1964_s18 + $0xe0] sm:$0xff]  ;;  %v318_v31 = vld [vmem:[%s1964_s18 + $0xe8] sm:$0xff] }
  0x23   : > { %1639 = vmatmul.mubr.msk.f32.gmra.mxu0 %vm322_vm1, %v294_v7  ;;  %1689 = vmatmul.mubr.msk.f32.gmra.mxu1 %vm322_vm1, %v294_v7  ;;  %v319_v32 = vld [vmem:[%s1964_s18 + $0xf0] sm:$0xff]  ;;  %v320_v33 = vld [vmem:[%s1964_s18 + $0xf8] sm:$0xff]  ;;  %s2491_s18 = scalar_lea.hbm %s2573_s5, %s1954_s13 }
  0x24   : > { %1641 = vmatprep.mubr.msk.f32.mxu0 %vm322_vm1, %v295_v8  ;;  %1691 = vmatprep.mubr.msk.f32.mxu1 %vm322_vm1, %v295_v8 }
  0x27   : > { %1642 = vmatmul.mubr.msk.f32.gmra.mxu0 %vm322_vm1, %v296_v9  ;;  %1692 = vmatmul.mubr.msk.f32.gmra.mxu1 %vm322_vm1, %v296_v9 }
  0x28   : > { %1644 = vmatprep.mubr.msk.f32.mxu0 %vm322_vm1, %v297_v10  ;;  %1694 = vmatprep.mubr.msk.f32.mxu1 %vm322_vm1, %v297_v10 }
  0x2b   : > { %1645 = vmatmul.mubr.msk.f32.gmra.mxu0 %vm322_vm1, %v298_v11  ;;  %1695 = vmatmul.mubr.msk.f32.gmra.mxu1 %vm322_vm1, %v298_v11 }
  0x2c   : > { %1647 = vmatprep.mubr.msk.f32.mxu0 %vm322_vm1, %v299_v12  ;;  %1697 = vmatprep.mubr.msk.f32.mxu1 %vm322_vm1, %v299_v12 }
  0x2f   : > { %1648 = vmatmul.mubr.msk.f32.gmra.mxu0 %vm322_vm1, %v300_v13  ;;  %1698 = vmatmul.mubr.msk.f32.gmra.mxu1 %vm322_vm1, %v300_v13 }
  0x30   : > { %1650 = vmatprep.mubr.msk.f32.mxu0 %vm322_vm1, %v301_v14  ;;  %1700 = vmatprep.mubr.msk.f32.mxu1 %vm322_vm1, %v301_v14 }
  0x33   : > { %1651 = vmatmul.mubr.msk.f32.gmra.mxu0 %vm322_vm1, %v302_v15  ;;  %1701 = vmatmul.mubr.msk.f32.gmra.mxu1 %vm322_vm1, %v302_v15 }
  0x34   : > { %1653 = vmatprep.mubr.msk.f32.mxu0 %vm322_vm1, %v303_v16  ;;  %1703 = vmatprep.mubr.msk.f32.mxu1 %vm322_vm1, %v303_v16 }
  0x37   : > { %1654 = vmatmul.mubr.msk.f32.gmra.mxu0 %vm322_vm1, %v304_v17  ;;  %1704 = vmatmul.mubr.msk.f32.gmra.mxu1 %vm322_vm1, %v304_v17 }
  0x38   : > { %1656 = vmatprep.mubr.msk.f32.mxu0 %vm322_vm1, %v305_v18  ;;  %1706 = vmatprep.mubr.msk.f32.mxu1 %vm322_vm1, %v305_v18 }
  0x3b   : > { %1657 = vmatmul.mubr.msk.f32.gmra.mxu0 %vm322_vm1, %v306_v19  ;;  %1707 = vmatmul.mubr.msk.f32.gmra.mxu1 %vm322_vm1, %v306_v19 }
  0x3c   : > { %1659 = vmatprep.mubr.msk.f32.mxu0 %vm322_vm1, %v307_v20  ;;  %1709 = vmatprep.mubr.msk.f32.mxu1 %vm322_vm1, %v307_v20 }
  0x3f   : > { %1660 = vmatmul.mubr.msk.f32.gmra.mxu0 %vm322_vm1, %v308_v21  ;;  %1710 = vmatmul.mubr.msk.f32.gmra.mxu1 %vm322_vm1, %v308_v21 }
  0x40   : > { %1662 = vmatprep.mubr.msk.f32.mxu0 %vm322_vm1, %v309_v22  ;;  %1712 = vmatprep.mubr.msk.f32.mxu1 %vm322_vm1, %v309_v22 }
  0x43   : > { %1663 = vmatmul.mubr.msk.f32.gmra.mxu0 %vm322_vm1, %v310_v23  ;;  %1713 = vmatmul.mubr.msk.f32.gmra.mxu1 %vm322_vm1, %v310_v23 }
  0x44   : > { %1665 = vmatprep.mubr.msk.f32.mxu0 %vm322_vm1, %v311_v24  ;;  %1715 = vmatprep.mubr.msk.f32.mxu1 %vm322_vm1, %v311_v24 }
  0x47   : > { %1666 = vmatmul.mubr.msk.f32.gmra.mxu0 %vm322_vm1, %v312_v25  ;;  %1716 = vmatmul.mubr.msk.f32.gmra.mxu1 %vm322_vm1, %v312_v25 }
  0x48   : > { %1668 = vmatprep.mubr.msk.f32.mxu0 %vm322_vm1, %v313_v26  ;;  %1718 = vmatprep.mubr.msk.f32.mxu1 %vm322_vm1, %v313_v26 }
  0x4b   : > { %1669 = vmatmul.mubr.msk.f32.gmra.mxu0 %vm322_vm1, %v314_v27  ;;  %1719 = vmatmul.mubr.msk.f32.gmra.mxu1 %vm322_vm1, %v314_v27 }
  0x4c   : > { %1671 = vmatprep.mubr.msk.f32.mxu0 %vm322_vm1, %v315_v28  ;;  %1721 = vmatprep.mubr.msk.f32.mxu1 %vm322_vm1, %v315_v28 }
  0x4f   : > { %1672 = vmatmul.mubr.msk.f32.gmra.mxu0 %vm322_vm1, %v316_v29  ;;  %1722 = vmatmul.mubr.msk.f32.gmra.mxu1 %vm322_vm1, %v316_v29 }
  0x50   : > { %1674 = vmatprep.mubr.msk.f32.mxu0 %vm322_vm1, %v317_v30  ;;  %1724 = vmatprep.mubr.msk.f32.mxu1 %vm322_vm1, %v317_v30 }
  0x53   : > { %1675 = vmatmul.mubr.msk.f32.gmra.mxu0 %vm322_vm1, %v318_v31  ;;  %1725 = vmatmul.mubr.msk.f32.gmra.mxu1 %vm322_vm1, %v318_v31 }
  0x54   : > { %1677 = vmatprep.mubr.msk.f32.mxu0 %vm322_vm1, %v319_v32  ;;  %1727 = vmatprep.mubr.msk.f32.mxu1 %vm322_vm1, %v319_v32 }
  0x57   : > { %1678 = vmatmul.mubr.msk.f32.gmra.mxu0 %vm322_vm1, %v320_v33  ;;  %1728 = vmatmul.mubr.msk.f32.gmra.mxu1 %vm322_vm1, %v320_v33 }
  0xdb   : > { %v1634_v34 = vpop.f32.mrf.mxu0  ;;  %v1684_v35 = vpop.f32.mrf.mxu1 }
  0xdc   : > { %879 = vst.msk [vmem:[%s2066_s25 + $0x8] sm:$0xff] %vm877_vm2, %v1634_v34  ;;  %v1015_v36 = vmul.f32 %v1634_v34, %v1634_v34  ;;  %v1188_v37 = vmul.f32 %v1684_v35, %v1684_v35  ;;  %v944_v42 = vsel %vm877_vm2, %v1634_v34, 0.0  ;;  %v1117_v48 = vsel %vm910_vm3, %v1684_v35, 0.0 }
  0xdd   : > { %912 = vst.msk [vmem:[%s2072_s29 + $0x8] sm:$0xff] %vm910_vm3, %v1684_v35  ;;  %v489_v38 = vpop.f32.mrf.mxu0  ;;  %v718_v39 = vpop.f32.mrf.mxu1 }
  0xde   : > { %878 = vst.msk [vmem:[%s2066_s25] sm:$0xff] %vm877_vm2, %v489_v38  ;;  %v943_v40 = vsel %vm877_vm2, %v489_v38, 0.0  ;;  %v1014_v41 = vmul.f32 %v489_v38, %v489_v38  ;;  %v1116_v43 = vsel %vm910_vm3, %v718_v39, 0.0  ;;  %v1187_v44 = vmul.f32 %v718_v39, %v718_v39 }
  0xdf   : > { %911 = vst.msk [vmem:[%s2072_s29] sm:$0xff] %vm910_vm3, %v718_v39  ;;  %v1637_v45 = vpop.f32.mrf.mxu0  ;;  %v1687_v46 = vpop.f32.mrf.mxu1  ;;  %v1047_v47 = vsel %vm877_vm2, %v1015_v36, 0.0  ;;  %v1220_v49 = vsel %vm910_vm3, %v1188_v37, 0.0  ;;  %v945_v51 = vadd.f32 %v944_v42, %v943_v40  ;;  %v1118_v52 = vadd.f32 %v1117_v48, %v1116_v43 }
  0xe0   : > { %v1046_v50 = vsel %vm877_vm2, %v1014_v41, 0.0  ;;  %881 = vst.msk [vmem:[%s2066_s25 + $0x18] sm:$0xff] %vm877_vm2, %v1637_v45  ;;  %v1219_v53 = vsel %vm910_vm3, %v1187_v44, 0.0  ;;  %v1017_v54 = vmul.f32 %v1637_v45, %v1637_v45  ;;  %v948_v58 = vsel %vm877_vm2, %v1637_v45, 0.0 }
  0xe1   : > { %914 = vst.msk [vmem:[%s2072_s29 + $0x18] sm:$0xff] %vm910_vm3, %v1687_v46  ;;  %v499_v55 = vpop.f32.mrf.mxu0  ;;  %v728_v56 = vpop.f32.mrf.mxu1  ;;  %v1048_v57 = vadd.f32 %v1047_v47, %v1046_v50  ;;  %v1190_v61 = vmul.f32 %v1687_v46, %v1687_v46  ;;  %v1221_v3 = vadd.f32 %v1220_v49, %v1219_v53  ;;  %v1121_v4 = vsel %vm910_vm3, %v1687_v46, 0.0 }
  0xe2   : > { %880 = vst.msk [vmem:[%s2066_s25 + $0x10] sm:$0xff] %vm877_vm2, %v499_v55  ;;  %v946_v59 = vsel %vm877_vm2, %v499_v55, 0.0  ;;  %v1016_v60 = vmul.f32 %v499_v55, %v499_v55  ;;  %v1119_v63 = vsel %vm910_vm3, %v728_v56, 0.0  ;;  %v1189_v0 = vmul.f32 %v728_v56, %v728_v56 }
  0xe3   : > { %913 = vst.msk [vmem:[%s2072_s29 + $0x10] sm:$0xff] %vm910_vm3, %v728_v56  ;;  %v947_v62 = vadd.f32 %v946_v59, %v945_v51  ;;  %v1640_v1 = vpop.f32.mrf.mxu0  ;;  %v1690_v2 = vpop.f32.mrf.mxu1  ;;  %v1120_v6 = vadd.f32 %v1119_v63, %v1118_v52  ;;  %v1051_v7 = vsel %vm877_vm2, %v1017_v54, 0.0  ;;  %v1224_v17 = vsel %vm910_vm3, %v1190_v61, 0.0 }
  0xe4   : > { %v1049_v5 = vsel %vm877_vm2, %v1016_v60, 0.0  ;;  %883 = vst.msk [vmem:[%s2066_s25 + $0x28] sm:$0xff] %vm877_vm2, %v1640_v1  ;;  %v1222_v9 = vsel %vm910_vm3, %v1189_v0, 0.0  ;;  %v1019_v10 = vmul.f32 %v1640_v1, %v1640_v1  ;;  %v1192_v14 = vmul.f32 %v1690_v2, %v1690_v2 }
  0xe5   : > { %916 = vst.msk [vmem:[%s2072_s29 + $0x28] sm:$0xff] %vm910_vm3, %v1690_v2  ;;  %v1050_v8 = vadd.f32 %v1049_v5, %v1048_v57  ;;  %v509_v11 = vpop.f32.mrf.mxu0  ;;  %v738_v12 = vpop.f32.mrf.mxu1  ;;  %v1223_v13 = vadd.f32 %v1222_v9, %v1221_v3  ;;  %v949_v15 = vadd.f32 %v948_v58, %v947_v62  ;;  %v1122_v20 = vadd.f32 %v1121_v4, %v1120_v6 }
  0xe6   : > { %882 = vst.msk [vmem:[%s2066_s25 + $0x20] sm:$0xff] %vm877_vm2, %v509_v11  ;;  %v950_v16 = vsel %vm877_vm2, %v509_v11, 0.0  ;;  %v1018_v18 = vmul.f32 %v509_v11, %v509_v11  ;;  %v1123_v24 = vsel %vm910_vm3, %v738_v12, 0.0  ;;  %v1191_v25 = vmul.f32 %v738_v12, %v738_v12 }
  0xe7   : > { %915 = vst.msk [vmem:[%s2072_s29 + $0x20] sm:$0xff] %vm910_vm3, %v738_v12  ;;  %v1052_v19 = vadd.f32 %v1051_v7, %v1050_v8  ;;  %v1643_v21 = vpop.f32.mrf.mxu0  ;;  %v1693_v22 = vpop.f32.mrf.mxu1  ;;  %v951_v23 = vadd.f32 %v950_v16, %v949_v15  ;;  %v1225_v26 = vadd.f32 %v1224_v17, %v1223_v13  ;;  %v952_v27 = vsel %vm877_vm2, %v1640_v1, 0.0 }
  0xe8   : > { %885 = vst.msk [vmem:[%s2066_s25 + $0x38] sm:$0xff] %vm877_vm2, %v1643_v21  ;;  %v1125_v28 = vsel %vm910_vm3, %v1690_v2, 0.0  ;;  %v1053_v29 = vsel %vm877_vm2, %v1018_v18, 0.0  ;;  %v1124_v30 = vadd.f32 %v1123_v24, %v1122_v20  ;;  %v1055_v33 = vsel %vm877_vm2, %v1019_v10, 0.0 }
  0xe9   : > { %918 = vst.msk [vmem:[%s2072_s29 + $0x38] sm:$0xff] %vm910_vm3, %v1693_v22  ;;  %v519_v31 = vpop.f32.mrf.mxu0  ;;  %v748_v32 = vpop.f32.mrf.mxu1  ;;  %v1228_v34 = vsel %vm910_vm3, %v1192_v14, 0.0  ;;  %v1054_v35 = vadd.f32 %v1053_v29, %v1052_v19  ;;  %v1226_v36 = vsel %vm910_vm3, %v1191_v25, 0.0  ;;  %v1021_v38 = vmul.f32 %v1643_v21, %v1643_v21 }
  0xea   : > { %884 = vst.msk [vmem:[%s2066_s25 + $0x30] sm:$0xff] %vm877_vm2, %v519_v31  ;;  %v1227_v37 = vadd.f32 %v1226_v36, %v1225_v26  ;;  %v953_v39 = vadd.f32 %v952_v27, %v951_v23  ;;  %v954_v40 = vsel %vm877_vm2, %v519_v31, 0.0  ;;  %v1194_v43 = vmul.f32 %v1693_v22, %v1693_v22 }
  0xeb   : > { %917 = vst.msk [vmem:[%s2072_s29 + $0x30] sm:$0xff] %vm910_vm3, %v748_v32  ;;  %v1646_v41 = vpop.f32.mrf.mxu0  ;;  %v1696_v42 = vpop.f32.mrf.mxu1  ;;  %v1020_v44 = vmul.f32 %v519_v31, %v519_v31  ;;  %v1056_v45 = vadd.f32 %v1055_v33, %v1054_v35  ;;  %v1126_v46 = vadd.f32 %v1125_v28, %v1124_v30  ;;  %v1127_v48 = vsel %vm910_vm3, %v748_v32, 0.0 }
  0xec   : > { %887 = vst.msk [vmem:[%s2066_s25 + $0x48] sm:$0xff] %vm877_vm2, %v1646_v41  ;;  %v955_v47 = vadd.f32 %v954_v40, %v953_v39  ;;  %v1193_v49 = vmul.f32 %v748_v32, %v748_v32  ;;  %v1229_v50 = vadd.f32 %v1228_v34, %v1227_v37  ;;  %v956_v53 = vsel %vm877_vm2, %v1643_v21, 0.0 }
  0xed   : > { %920 = vst.msk [vmem:[%s2072_s29 + $0x48] sm:$0xff] %vm910_vm3, %v1696_v42  ;;  %v529_v51 = vpop.f32.mrf.mxu0  ;;  %v758_v52 = vpop.f32.mrf.mxu1  ;;  %v1129_v54 = vsel %vm910_vm3, %v1693_v22, 0.0  ;;  %v1057_v55 = vsel %vm877_vm2, %v1020_v44, 0.0  ;;  %v1128_v56 = vadd.f32 %v1127_v48, %v1126_v46  ;;  %v1059_v57 = vsel %vm877_vm2, %v1021_v38, 0.0 }
  0xee   : > { %886 = vst.msk [vmem:[%s2066_s25 + $0x40] sm:$0xff] %vm877_vm2, %v529_v51  ;;  %v1058_v58 = vadd.f32 %v1057_v55, %v1056_v45  ;;  %v1230_v59 = vsel %vm910_vm3, %v1193_v49, 0.0  ;;  %v1023_v60 = vmul.f32 %v1646_v41, %v1646_v41  ;;  %v1196_v0 = vmul.f32 %v1696_v42, %v1696_v42 }
  0xef   : > { %919 = vst.msk [vmem:[%s2072_s29 + $0x40] sm:$0xff] %vm910_vm3, %v758_v52  ;;  %v1649_v61 = vpop.f32.mrf.mxu0  ;;  %v1699_v62 = vpop.f32.mrf.mxu1  ;;  %v1231_v63 = vadd.f32 %v1230_v59, %v1229_v50  ;;  %v957_v1 = vadd.f32 %v956_v53, %v955_v47  ;;  %v958_v2 = vsel %vm877_vm2, %v529_v51, 0.0  ;;  %v1232_v3 = vsel %vm910_vm3, %v1194_v43, 0.0 }
  0xf0   : > { %889 = vst.msk [vmem:[%s2066_s25 + $0x58] sm:$0xff] %vm877_vm2, %v1649_v61  ;;  %v1022_v4 = vmul.f32 %v529_v51, %v529_v51  ;;  %v1060_v5 = vadd.f32 %v1059_v57, %v1058_v58  ;;  %v1130_v6 = vadd.f32 %v1129_v54, %v1128_v56  ;;  %v1131_v10 = vsel %vm910_vm3, %v758_v52, 0.0 }
  0xf1   : > { %922 = vst.msk [vmem:[%s2072_s29 + $0x58] sm:$0xff] %vm910_vm3, %v1699_v62  ;;  %v539_v7 = vpop.f32.mrf.mxu0  ;;  %v768_v8 = vpop.f32.mrf.mxu1  ;;  %v959_v9 = vadd.f32 %v958_v2, %v957_v1  ;;  %v1195_v11 = vmul.f32 %v758_v52, %v758_v52  ;;  %v1233_v12 = vadd.f32 %v1232_v3, %v1231_v63  ;;  %v960_v13 = vsel %vm877_vm2, %v1646_v41, 0.0 }
  0xf2   : > { %888 = vst.msk [vmem:[%s2066_s25 + $0x50] sm:$0xff] %vm877_vm2, %v539_v7  ;;  %v1133_v14 = vsel %vm910_vm3, %v1696_v42, 0.0  ;;  %v1061_v15 = vsel %vm877_vm2, %v1022_v4, 0.0  ;;  %v1132_v16 = vadd.f32 %v1131_v10, %v1130_v6  ;;  %v1063_v19 = vsel %vm877_vm2, %v1023_v60, 0.0 }
  0xf3   : > { %921 = vst.msk [vmem:[%s2072_s29 + $0x50] sm:$0xff] %vm910_vm3, %v768_v8  ;;  %v1652_v17 = vpop.f32.mrf.mxu0  ;;  %v1702_v18 = vpop.f32.mrf.mxu1  ;;  %v1236_v20 = vsel %vm910_vm3, %v1196_v0, 0.0  ;;  %v1062_v21 = vadd.f32 %v1061_v15, %v1060_v5  ;;  %v1234_v22 = vsel %vm910_vm3, %v1195_v11, 0.0  ;;  %v1025_v24 = vmul.f32 %v1649_v61, %v1649_v61 }
  0xf4   : > { %891 = vst.msk [vmem:[%s2066_s25 + $0x68] sm:$0xff] %vm877_vm2, %v1652_v17  ;;  %v1235_v23 = vadd.f32 %v1234_v22, %v1233_v12  ;;  %v961_v25 = vadd.f32 %v960_v13, %v959_v9  ;;  %v962_v26 = vsel %vm877_vm2, %v539_v7, 0.0  ;;  %v1198_v29 = vmul.f32 %v1699_v62, %v1699_v62 }
  0xf5   : > { %924 = vst.msk [vmem:[%s2072_s29 + $0x68] sm:$0xff] %vm910_vm3, %v1702_v18  ;;  %v549_v27 = vpop.f32.mrf.mxu0  ;;  %v778_v28 = vpop.f32.mrf.mxu1  ;;  %v1024_v30 = vmul.f32 %v539_v7, %v539_v7  ;;  %v1064_v31 = vadd.f32 %v1063_v19, %v1062_v21  ;;  %v1134_v32 = vadd.f32 %v1133_v14, %v1132_v16  ;;  %v1135_v34 = vsel %vm910_vm3, %v768_v8, 0.0 }
  0xf6   : > { %890 = vst.msk [vmem:[%s2066_s25 + $0x60] sm:$0xff] %vm877_vm2, %v549_v27  ;;  %v963_v33 = vadd.f32 %v962_v26, %v961_v25  ;;  %v1197_v35 = vmul.f32 %v768_v8, %v768_v8  ;;  %v1237_v36 = vadd.f32 %v1236_v20, %v1235_v23  ;;  %v964_v39 = vsel %vm877_vm2, %v1649_v61, 0.0 }
  0xf7   : > { %923 = vst.msk [vmem:[%s2072_s29 + $0x60] sm:$0xff] %vm910_vm3, %v778_v28  ;;  %v1655_v37 = vpop.f32.mrf.mxu0  ;;  %v1705_v38 = vpop.f32.mrf.mxu1  ;;  %v1137_v40 = vsel %vm910_vm3, %v1699_v62, 0.0  ;;  %v1065_v41 = vsel %vm877_vm2, %v1024_v30, 0.0  ;;  %v1136_v42 = vadd.f32 %v1135_v34, %v1134_v32  ;;  %v1067_v43 = vsel %vm877_vm2, %v1025_v24, 0.0 }
  0xf8   : > { %893 = vst.msk [vmem:[%s2066_s25 + $0x78] sm:$0xff] %vm877_vm2, %v1655_v37  ;;  %v1066_v44 = vadd.f32 %v1065_v41, %v1064_v31  ;;  %v1238_v45 = vsel %vm910_vm3, %v1197_v35, 0.0  ;;  %v1027_v46 = vmul.f32 %v1652_v17, %v1652_v17  ;;  %v1200_v50 = vmul.f32 %v1702_v18, %v1702_v18 }
  0xf9   : > { %926 = vst.msk [vmem:[%s2072_s29 + $0x78] sm:$0xff] %vm910_vm3, %v1705_v38  ;;  %v559_v47 = vpop.f32.mrf.mxu0  ;;  %v788_v48 = vpop.f32.mrf.mxu1  ;;  %v1239_v49 = vadd.f32 %v1238_v45, %v1237_v36  ;;  %v965_v51 = vadd.f32 %v964_v39, %v963_v33  ;;  %v966_v52 = vsel %vm877_vm2, %v549_v27, 0.0  ;;  %v1240_v53 = vsel %vm910_vm3, %v1198_v29, 0.0 }
  0xfa   : > { %892 = vst.msk [vmem:[%s2066_s25 + $0x70] sm:$0xff] %vm877_vm2, %v559_v47  ;;  %v1026_v54 = vmul.f32 %v549_v27, %v549_v27  ;;  %v1068_v55 = vadd.f32 %v1067_v43, %v1066_v44  ;;  %v1138_v56 = vadd.f32 %v1137_v40, %v1136_v42  ;;  %v1139_v60 = vsel %vm910_vm3, %v778_v28, 0.0 }
  0xfb   : > { %925 = vst.msk [vmem:[%s2072_s29 + $0x70] sm:$0xff] %vm910_vm3, %v788_v48  ;;  %v2187_v57 = vpop.f32.mrf.mxu0  ;;  %v2189_v58 = vpop.f32.mrf.mxu1  ;;  %v967_v59 = vadd.f32 %v966_v52, %v965_v51  ;;  %v1199_v61 = vmul.f32 %v778_v28, %v778_v28  ;;  %v1241_v62 = vadd.f32 %v1240_v53, %v1239_v49  ;;  %v968_v63 = vsel %vm877_vm2, %v1652_v17, 0.0 }
  0xfc   : > { %895 = vst.msk [vmem:[%s2066_s25 + $0x88] sm:$0xff] %vm877_vm2, %v2187_v57  ;;  %v1141_v0 = vsel %vm910_vm3, %v1702_v18, 0.0  ;;  %v1069_v1 = vsel %vm877_vm2, %v1026_v54, 0.0  ;;  %v1140_v2 = vadd.f32 %v1139_v60, %v1138_v56  ;;  %v1071_v5 = vsel %vm877_vm2, %v1027_v46, 0.0 }
  0xfd   : > { %928 = vst.msk [vmem:[%s2072_s29 + $0x88] sm:$0xff] %vm910_vm3, %v2189_v58  ;;  %v569_v3 = vpop.f32.mrf.mxu0  ;;  %v798_v4 = vpop.f32.mrf.mxu1  ;;  %v1244_v6 = vsel %vm910_vm3, %v1200_v50, 0.0  ;;  %v1070_v7 = vadd.f32 %v1069_v1, %v1068_v55  ;;  %v1242_v8 = vsel %vm910_vm3, %v1199_v61, 0.0  ;;  %v1029_v10 = vmul.f32 %v1655_v37, %v1655_v37 }
  0xfe   : > { %894 = vst.msk [vmem:[%s2066_s25 + $0x80] sm:$0xff] %vm877_vm2, %v569_v3  ;;  %v1243_v9 = vadd.f32 %v1242_v8, %v1241_v62  ;;  %v969_v11 = vadd.f32 %v968_v63, %v967_v59  ;;  %v970_v12 = vsel %vm877_vm2, %v559_v47, 0.0  ;;  %v1202_v15 = vmul.f32 %v1705_v38, %v1705_v38 }
  0xff   : > { %927 = vst.msk [vmem:[%s2072_s29 + $0x80] sm:$0xff] %vm910_vm3, %v798_v4  ;;  %v2209_v13 = vpop.f32.mrf.mxu0  ;;  %v2211_v14 = vpop.f32.mrf.mxu1  ;;  %v1028_v16 = vmul.f32 %v559_v47, %v559_v47  ;;  %v1072_v17 = vadd.f32 %v1071_v5, %v1070_v7  ;;  %v1142_v18 = vadd.f32 %v1141_v0, %v1140_v2  ;;  %v1143_v20 = vsel %vm910_vm3, %v788_v48, 0.0 }
 0x100   : > { %897 = vst.msk [vmem:[%s2066_s25 + $0x98] sm:$0xff] %vm877_vm2, %v2209_v13  ;;  %v971_v19 = vadd.f32 %v970_v12, %v969_v11  ;;  %v1201_v21 = vmul.f32 %v788_v48, %v788_v48  ;;  %v1245_v22 = vadd.f32 %v1244_v6, %v1243_v9  ;;  %v972_v25 = vsel %vm877_vm2, %v1655_v37, 0.0 }
 0x101   : > { %930 = vst.msk [vmem:[%s2072_s29 + $0x98] sm:$0xff] %vm910_vm3, %v2211_v14  ;;  %v579_v23 = vpop.f32.mrf.mxu0  ;;  %v808_v24 = vpop.f32.mrf.mxu1  ;;  %v1145_v26 = vsel %vm910_vm3, %v1705_v38, 0.0  ;;  %v1073_v27 = vsel %vm877_vm2, %v1028_v16, 0.0  ;;  %v1144_v28 = vadd.f32 %v1143_v20, %v1142_v18  ;;  %v1075_v29 = vsel %vm877_vm2, %v1029_v10, 0.0 }
 0x102   : > { %896 = vst.msk [vmem:[%s2066_s25 + $0x90] sm:$0xff] %vm877_vm2, %v579_v23  ;;  %v1074_v30 = vadd.f32 %v1073_v27, %v1072_v17  ;;  %v1246_v31 = vsel %vm910_vm3, %v1201_v21, 0.0  ;;  %v1031_v32 = vmul.f32 %v2187_v57, %v2187_v57  ;;  %v1204_v36 = vmul.f32 %v2189_v58, %v2189_v58 }
 0x103   : > { %929 = vst.msk [vmem:[%s2072_s29 + $0x90] sm:$0xff] %vm910_vm3, %v808_v24  ;;  %v2231_v33 = vpop.f32.mrf.mxu0  ;;  %v2233_v34 = vpop.f32.mrf.mxu1  ;;  %v1247_v35 = vadd.f32 %v1246_v31, %v1245_v22  ;;  %v973_v37 = vadd.f32 %v972_v25, %v971_v19  ;;  %v974_v38 = vsel %vm877_vm2, %v569_v3, 0.0  ;;  %v1248_v39 = vsel %vm910_vm3, %v1202_v15, 0.0 }
 0x104   : > { %899 = vst.msk [vmem:[%s2066_s25 + $0xa8] sm:$0xff] %vm877_vm2, %v2231_v33  ;;  %v1030_v40 = vmul.f32 %v569_v3, %v569_v3  ;;  %v1076_v41 = vadd.f32 %v1075_v29, %v1074_v30  ;;  %v1146_v42 = vadd.f32 %v1145_v26, %v1144_v28  ;;  %v1147_v46 = vsel %vm910_vm3, %v798_v4, 0.0 }
 0x105   : > { %932 = vst.msk [vmem:[%s2072_s29 + $0xa8] sm:$0xff] %vm910_vm3, %v2233_v34  ;;  %v589_v43 = vpop.f32.mrf.mxu0  ;;  %v818_v44 = vpop.f32.mrf.mxu1  ;;  %v975_v45 = vadd.f32 %v974_v38, %v973_v37  ;;  %v1203_v47 = vmul.f32 %v798_v4, %v798_v4  ;;  %v1249_v48 = vadd.f32 %v1248_v39, %v1247_v35  ;;  %v976_v49 = vsel %vm877_vm2, %v2187_v57, 0.0 }
 0x106   : > { %898 = vst.msk [vmem:[%s2066_s25 + $0xa0] sm:$0xff] %vm877_vm2, %v589_v43  ;;  %v1149_v50 = vsel %vm910_vm3, %v2189_v58, 0.0  ;;  %v1077_v51 = vsel %vm877_vm2, %v1030_v40, 0.0  ;;  %v1148_v52 = vadd.f32 %v1147_v46, %v1146_v42  ;;  %v1079_v55 = vsel %vm877_vm2, %v1031_v32, 0.0 }
 0x107   : > { %931 = vst.msk [vmem:[%s2072_s29 + $0xa0] sm:$0xff] %vm910_vm3, %v818_v44  ;;  %v2255_v53 = vpop.f32.mrf.mxu0  ;;  %v2257_v54 = vpop.f32.mrf.mxu1  ;;  %v1252_v56 = vsel %vm910_vm3, %v1204_v36, 0.0  ;;  %v1078_v59 = vadd.f32 %v1077_v51, %v1076_v41  ;;  %v1250_v60 = vsel %vm910_vm3, %v1203_v47, 0.0  ;;  %v1033_v58 = vmul.f32 %v2209_v13, %v2209_v13 }
 0x108   : > { %901 = vst.msk [vmem:[%s2066_s25 + $0xb8] sm:$0xff] %vm877_vm2, %v2255_v53  ;;  %v1251_v57 = vadd.f32 %v1250_v60, %v1249_v48  ;;  %v977_v61 = vadd.f32 %v976_v49, %v975_v45  ;;  %v978_v62 = vsel %vm877_vm2, %v579_v23, 0.0  ;;  %v1206_v1 = vmul.f32 %v2211_v14, %v2211_v14 }
 0x109   : > { %934 = vst.msk [vmem:[%s2072_s29 + $0xb8] sm:$0xff] %vm910_vm3, %v2257_v54  ;;  %v2271_v63 = vpop.f32.mrf.mxu0  ;;  %v2273_v0 = vpop.f32.mrf.mxu1  ;;  %v1032_v2 = vmul.f32 %v579_v23, %v579_v23  ;;  %v1080_v3 = vadd.f32 %v1079_v55, %v1078_v59  ;;  %v1150_v4 = vadd.f32 %v1149_v50, %v1148_v52  ;;  %v1151_v6 = vsel %vm910_vm3, %v808_v24, 0.0 }
 0x10a   : > { %900 = vst.msk [vmem:[%s2066_s25 + $0xb0] sm:$0xff] %vm877_vm2, %v2271_v63  ;;  %v979_v5 = vadd.f32 %v978_v62, %v977_v61  ;;  %v1205_v7 = vmul.f32 %v808_v24, %v808_v24  ;;  %v1253_v8 = vadd.f32 %v1252_v56, %v1251_v57  ;;  %v980_v11 = vsel %vm877_vm2, %v2209_v13, 0.0 }
 0x10b   : > { %933 = vst.msk [vmem:[%s2072_s29 + $0xb0] sm:$0xff] %vm910_vm3, %v2273_v0  ;;  %v2284_v9 = vpop.f32.mrf.mxu0  ;;  %v2286_v10 = vpop.f32.mrf.mxu1  ;;  %v1153_v12 = vsel %vm910_vm3, %v2211_v14, 0.0  ;;  %v1081_v15 = vsel %vm877_vm2, %v1032_v2, 0.0  ;;  %v1152_v16 = vadd.f32 %v1151_v6, %v1150_v4  ;;  %v1083_v17 = vsel %vm877_vm2, %v1033_v58, 0.0 }
 0x10c   : > { %903 = vst.msk [vmem:[%s2066_s25 + $0xc8] sm:$0xff] %vm877_vm2, %v2284_v9  ;;  %v1082_v18 = vadd.f32 %v1081_v15, %v1080_v3  ;;  %v1254_v19 = vsel %vm910_vm3, %v1205_v7, 0.0  ;;  %v1035_v13 = vmul.f32 %v2231_v33, %v2231_v33  ;;  %v1208_v22 = vmul.f32 %v2233_v34, %v2233_v34 }
 0x10d   : > { %936 = vst.msk [vmem:[%s2072_s29 + $0xc8] sm:$0xff] %vm910_vm3, %v2286_v10  ;;  %v2303_v20 = vpop.f32.mrf.mxu0  ;;  %v2305_v14 = vpop.f32.mrf.mxu1  ;;  %v1255_v21 = vadd.f32 %v1254_v19, %v1253_v8  ;;  %v981_v23 = vadd.f32 %v980_v11, %v979_v5  ;;  %v982_v24 = vsel %vm877_vm2, %v589_v43, 0.0  ;;  %v1256_v25 = vsel %vm910_vm3, %v1206_v1, 0.0 }
 0x10e   : > { %902 = vst.msk [vmem:[%s2066_s25 + $0xc0] sm:$0xff] %vm877_vm2, %v2303_v20  ;;  %v1034_v26 = vmul.f32 %v589_v43, %v589_v43  ;;  %v1084_v27 = vadd.f32 %v1083_v17, %v1082_v18  ;;  %v1154_v28 = vadd.f32 %v1153_v12, %v1152_v16  ;;  %v1155_v32 = vsel %vm910_vm3, %v818_v44, 0.0 }
 0x10f   : > { %935 = vst.msk [vmem:[%s2072_s29 + $0xc0] sm:$0xff] %vm910_vm3, %v2305_v14  ;;  %v2317_v29 = vpop.f32.mrf.mxu0  ;;  %v2319_v30 = vpop.f32.mrf.mxu1  ;;  %v983_v31 = vadd.f32 %v982_v24, %v981_v23  ;;  %v1207_v35 = vmul.f32 %v818_v44, %v818_v44  ;;  %v1257_v36 = vadd.f32 %v1256_v25, %v1255_v21  ;;  %v984_v37 = vsel %vm877_vm2, %v2231_v33, 0.0 }
 0x110   : > { %905 = vst.msk [vmem:[%s2066_s25 + $0xd8] sm:$0xff] %vm877_vm2, %v2317_v29  ;;  %v1157_v38 = vsel %vm910_vm3, %v2233_v34, 0.0  ;;  %v1085_v39 = vsel %vm877_vm2, %v1034_v26, 0.0  ;;  %v1156_v40 = vadd.f32 %v1155_v32, %v1154_v28  ;;  %v1087_v43 = vsel %vm877_vm2, %v1035_v13, 0.0 }
 0x111   : > { %938 = vst.msk [vmem:[%s2072_s29 + $0xd8] sm:$0xff] %vm910_vm3, %v2319_v30  ;;  %v2333_v41 = vpop.f32.mrf.mxu0  ;;  %v2335_v42 = vpop.f32.mrf.mxu1  ;;  %v1260_v44 = vsel %vm910_vm3, %v1208_v22, 0.0  ;;  %v1086_v45 = vadd.f32 %v1085_v39, %v1084_v27  ;;  %v1258_v46 = vsel %vm910_vm3, %v1207_v35, 0.0  ;;  %v1037_v34 = vmul.f32 %v2255_v53, %v2255_v53 }
 0x112   : > { %904 = vst.msk [vmem:[%s2066_s25 + $0xd0] sm:$0xff] %vm877_vm2, %v2333_v41  ;;  %v1259_v33 = vadd.f32 %v1258_v46, %v1257_v36  ;;  %v985_v47 = vadd.f32 %v984_v37, %v983_v31  ;;  %v986_v48 = vsel %vm877_vm2, %v2271_v63, 0.0  ;;  %v1210_v51 = vmul.f32 %v2257_v54, %v2257_v54 }
 0x113   : > { %937 = vst.msk [vmem:[%s2072_s29 + $0xd0] sm:$0xff] %vm910_vm3, %v2335_v42  ;;  %v2350_v49 = vpop.f32.mrf.mxu0  ;;  %v2352_v50 = vpop.f32.mrf.mxu1  ;;  %v1036_v52 = vmul.f32 %v2271_v63, %v2271_v63  ;;  %v1088_v55 = vadd.f32 %v1087_v43, %v1086_v45  ;;  %v1158_v56 = vadd.f32 %v1157_v38, %v1156_v40  ;;  %v1159_v60 = vsel %vm910_vm3, %v2273_v0, 0.0 }
 0x114   : > { %907 = vst.msk [vmem:[%s2066_s25 + $0xe8] sm:$0xff] %vm877_vm2, %v2350_v49  ;;  %v987_v59 = vadd.f32 %v986_v48, %v985_v47  ;;  %v1209_v57 = vmul.f32 %v2273_v0, %v2273_v0  ;;  %v1261_v58 = vadd.f32 %v1260_v44, %v1259_v33  ;;  %v988_v63 = vsel %vm877_vm2, %v2255_v53, 0.0 }
 0x115   : > { %940 = vst.msk [vmem:[%s2072_s29 + $0xe8] sm:$0xff] %vm910_vm3, %v2352_v50  ;;  %v2368_v61 = vpop.f32.mrf.mxu0  ;;  %v2370_v62 = vpop.f32.mrf.mxu1  ;;  %v1161_v1 = vsel %vm910_vm3, %v2257_v54, 0.0  ;;  %v1089_v2 = vsel %vm877_vm2, %v1036_v52, 0.0  ;;  %v1160_v3 = vadd.f32 %v1159_v60, %v1158_v56  ;;  %v1091_v0 = vsel %vm877_vm2, %v1037_v34, 0.0 }
 0x116   : > { %906 = vst.msk [vmem:[%s2066_s25 + $0xe0] sm:$0xff] %vm877_vm2, %v2368_v61  ;;  %v1090_v4 = vadd.f32 %v1089_v2, %v1088_v55  ;;  %v1262_v5 = vsel %vm910_vm3, %v1209_v57, 0.0  ;;  %v1039_v53 = vmul.f32 %v2284_v9, %v2284_v9  ;;  %v1212_v8 = vmul.f32 %v2286_v10, %v2286_v10 }
 0x117   : > { %939 = vst.msk [vmem:[%s2072_s29 + $0xe0] sm:$0xff] %vm910_vm3, %v2370_v62  ;;  %v2387_v6 = vpop.f32.mrf.mxu0  ;;  %v2389_v54 = vpop.f32.mrf.mxu1  ;;  %v1263_v7 = vadd.f32 %v1262_v5, %v1261_v58  ;;  %v989_v11 = vadd.f32 %v988_v63, %v987_v59  ;;  %v990_v12 = vsel %vm877_vm2, %v2303_v20, 0.0  ;;  %v1264_v15 = vsel %vm910_vm3, %v1210_v51, 0.0 }
 0x118   : > { %909 = vst.msk [vmem:[%s2066_s25 + $0xf8] sm:$0xff] %vm877_vm2, %v2387_v6  ;;  %v1038_v16 = vmul.f32 %v2303_v20, %v2303_v20  ;;  %v1092_v17 = vadd.f32 %v1091_v0, %v1090_v4  ;;  %v1162_v18 = vadd.f32 %v1161_v1, %v1160_v3  ;;  %v1163_v22 = vsel %vm910_vm3, %v2305_v14, 0.0 }
 0x119   : > { %942 = vst.msk [vmem:[%s2072_s29 + $0xf8] sm:$0xff] %vm910_vm3, %v2389_v54  ;;  %v639_v19 = vpop.f32.mrf.mxu0  ;;  %v2404_v13 = vpop.f32.mrf.mxu1  ;;  %v991_v21 = vadd.f32 %v990_v12, %v989_v11  ;;  %v1211_v23 = vmul.f32 %v2305_v14, %v2305_v14  ;;  %v1265_v24 = vadd.f32 %v1264_v15, %v1263_v7  ;;  %v992_v20 = vsel %vm877_vm2, %v2284_v9, 0.0 }
 0x11a   : > { %908 = vst.msk [vmem:[%s2066_s25 + $0xf0] sm:$0xff] %vm877_vm2, %v639_v19  ;;  %v1165_v25 = vsel %vm910_vm3, %v2286_v10, 0.0  ;;  %v1093_v26 = vsel %vm877_vm2, %v1038_v16, 0.0  ;;  %v1164_v27 = vadd.f32 %v1163_v22, %v1162_v18  ;;  %v1095_v28 = vsel %vm877_vm2, %v1039_v53, 0.0  ;;  %s2502_s25 = scalar_lea.hbm %s2574_s6, %s1954_s13 }
 0x11b   : > { %941 = vst.msk [vmem:[%s2072_s29 + $0xf0] sm:$0xff] %vm910_vm3, %v2404_v13  ;;  %v1268_v31 = vsel %vm910_vm3, %v1212_v8, 0.0  ;;  %v1094_v14 = vadd.f32 %v1093_v26, %v1092_v17  ;;  %v1266_v32 = vsel %vm910_vm3, %v1211_v23, 0.0  ;;  %v1041_v36 = vmul.f32 %v2317_v29, %v2317_v29  ;;  %s1866_s29 = smov [#allocation2]  }
 0x11c   : > { %v1267_v35 = vadd.f32 %v1266_v32, %v1265_v24  ;;  %v993_v37 = vadd.f32 %v992_v20, %v991_v21  ;;  %v994_v9 = vsel %vm877_vm2, %v2333_v41, 0.0  ;;  %v1214_v10 = vmul.f32 %v2319_v30, %v2319_v30  ;;  %s1778_s10 = sshll.u32 %s1866_s29, 4  ;;  %s1779_s10 = int_to_ptr.vmem [resolvable:$false] %s1778_s10 }
 0x11d   : > { %v1040_v38 = vmul.f32 %v2333_v41, %v2333_v41  ;;  %v1096_v39 = vadd.f32 %v1095_v28, %v1094_v14  ;;  %v1166_v40 = vadd.f32 %v1165_v25, %v1164_v27  ;;  %v1167_v44 = vsel %vm910_vm3, %v2335_v42, 0.0  ;;  %s1780_s16 = scalar_lea.vmem %s1779_s10, 64  ;;  %p1781_p0 = scmp.lt.s32.totalorder %s2494_s12, %s1779_s10 }
 0x11e   : > { %v995_v43 = vadd.f32 %v994_v9, %v993_v37  ;;  %v1213_v45 = vmul.f32 %v2335_v42, %v2335_v42  ;;  %v1269_v46 = vadd.f32 %v1268_v31, %v1267_v35  ;;  %v996_v33 = vsel %vm877_vm2, %v2317_v29, 0.0  ;;  %p1782_p1 = scmp.lt.s32.totalorder %s1780_s16, %s1774_s28 }
 0x11f   : > { %v1169_v34 = vsel %vm910_vm3, %v2319_v30, 0.0  ;;  %v1097_v47 = vsel %vm877_vm2, %v1040_v38, 0.0  ;;  %v1168_v48 = vadd.f32 %v1167_v44, %v1166_v40  ;;  %v1099_v41 = vsel %vm877_vm2, %v1041_v36, 0.0 }
 0x120   : > { %v1098_v51 = vadd.f32 %v1097_v47, %v1096_v39  ;;  %v1270_v52 = vsel %vm910_vm3, %v1213_v45, 0.0  ;;  %v1043_v55 = vmul.f32 %v2350_v49, %v2350_v49  ;;  %v1216_v42 = vmul.f32 %v2352_v50, %v2352_v50  ;;  %p1783_p2 = por %p1782_p1, %p1781_p0 }
 0x121   : > { %v1271_v56 = vadd.f32 %v1270_v52, %v1269_v46  ;;  %v997_v59 = vadd.f32 %v996_v33, %v995_v43  ;;  %v998_v29 = vsel %vm877_vm2, %v2368_v61, 0.0  ;;  %v1272_v30 = vsel %vm910_vm3, %v1214_v10, 0.0 }
 0x122   : > { %v1042_v60 = vmul.f32 %v2368_v61, %v2368_v61  ;;  %v1100_v57 = vadd.f32 %v1099_v41, %v1098_v51  ;;  %v1170_v58 = vadd.f32 %v1169_v34, %v1168_v48  ;;  %v1171_v1 = vsel %vm910_vm3, %v2370_v62, 0.0  ;;  %p1784_p3 = pnand %p1783_p2, %p1777_p13 }
 0x123   : > { %v999_v63 = vadd.f32 %v998_v29, %v997_v59  ;;  %v1215_v2 = vmul.f32 %v2370_v62, %v2370_v62  ;;  %v1273_v3 = vadd.f32 %v1272_v30, %v1271_v56  ;;  %v1000_v0 = vsel %vm877_vm2, %v2350_v49, 0.0 }
 0x124   : > { %v1173_v4 = vsel %vm910_vm3, %v2352_v50, 0.0  ;;  %v1101_v5 = vsel %vm877_vm2, %v1042_v60, 0.0  ;;  %v1172_v53 = vadd.f32 %v1171_v1, %v1170_v58  ;;  %v1103_v61 = vsel %vm877_vm2, %v1043_v55, 0.0 }
 0x125   : > { %v1276_v7 = vsel %vm910_vm3, %v1216_v42, 0.0  ;;  %v1102_v8 = vadd.f32 %v1101_v5, %v1100_v57  ;;  %v1274_v11 = vsel %vm910_vm3, %v1215_v2, 0.0  ;;  %v1045_v62 = vmul.f32 %v2387_v6, %v2387_v6 }
 0x126   : > { %v1275_v12 = vadd.f32 %v1274_v11, %v1273_v3  ;;  %v1001_v15 = vadd.f32 %v1000_v0, %v999_v63  ;;  %v1002_v49 = vsel %vm877_vm2, %v639_v19, 0.0  ;;  %v1218_v50 = vmul.f32 %v2389_v54, %v2389_v54 }
 0x127   : > { %v1044_v16 = vmul.f32 %v639_v19, %v639_v19  ;;  %v1104_v17 = vadd.f32 %v1103_v61, %v1102_v8  ;;  %v1174_v18 = vadd.f32 %v1173_v4, %v1172_v53  ;;  %v1175_v22 = vsel %vm910_vm3, %v2404_v13, 0.0 }
 0x128   : > { %v1003_v21 = vadd.f32 %v1002_v49, %v1001_v15  ;;  %v1217_v23 = vmul.f32 %v2404_v13, %v2404_v13  ;;  %v1277_v24 = vadd.f32 %v1276_v7, %v1275_v12  ;;  %v1004_v20 = vsel %vm877_vm2, %v2387_v6, 0.0 }
 0x129   : > { %v1105_v25 = vsel %vm877_vm2, %v1044_v16, 0.0  ;;  %v1176_v26 = vadd.f32 %v1175_v22, %v1174_v18  ;;  %v1177_v19 = vsel %vm910_vm3, %v2389_v54, 0.0  ;;  %v1107_v14 = vsel %vm877_vm2, %v1045_v62, 0.0 }
 0x12a   : > { %v1005_v27 = vadd.f32 %v1004_v20, %v1003_v21  ;;  %v1106_v28 = vadd.f32 %v1105_v25, %v1104_v17  ;;  %v1278_v31 = vsel %vm910_vm3, %v1217_v23, 0.0  ;;  %v1280_v13 = vsel %vm910_vm3, %v1218_v50, 0.0 }
 0x12b   : > { %v1178_v32 = vadd.f32 %v1177_v19, %v1176_v26  ;;  %v1279_v35 = vadd.f32 %v1278_v31, %v1277_v24 }
 0x12c   : > { %v1006_v36 = vrot.slane %v1005_v27, 4  ;;  %v1108_v37 = vadd.f32 %v1107_v14, %v1106_v28 }
 0x12d   : > { %v1179_v6 = vrot.slane %v1178_v32, 4  ;;  %v1281_v9 = vadd.f32 %v1280_v13, %v1279_v35 }
 0x12e   : > { %v1007_v10 = vadd.f32 %v1006_v36, %v1005_v27  ;;  %v1109_v38 = vrot.slane %v1108_v37, 4 }
 0x12f   : > { %v1180_v54 = vadd.f32 %v1179_v6, %v1178_v32  ;;  %v1282_v39 = vrot.slane %v1281_v9, 4 }
 0x130   : > { %v1008_v40 = vrot.slane %v1007_v10, 2  ;;  %v1110_v43 = vadd.f32 %v1109_v38, %v1108_v37 }
 0x131   : > { %v1181_v44 = vrot.slane %v1180_v54, 2  ;;  %v1283_v45 = vadd.f32 %v1282_v39, %v1281_v9 }
 0x132   : > { %v1009_v46 = vadd.f32 %v1008_v40, %v1007_v10  ;;  %v1111_v33 = vrot.slane %v1110_v43, 2 }
 0x133   : > { %v1182_v34 = vadd.f32 %v1181_v44, %v1180_v54  ;;  %v1284_v47 = vrot.slane %v1283_v45, 2 }
 0x134   : > { %v1010_v48 = vrot.slane %v1009_v46, 1  ;;  %v1112_v41 = vadd.f32 %v1111_v33, %v1110_v43 }
 0x135   : > { %v1183_v51 = vrot.slane %v1182_v34, 1  ;;  %v1285_v52 = vadd.f32 %v1284_v47, %v1283_v45 }
 0x136   : > { %v1011_v55 = vadd.f32 %v1010_v48, %v1009_v46  ;;  %v1113_v56 = vrot.slane %v1112_v41, 1 }
 0x137   : > { %v1184_v42 = vadd.f32 %v1183_v51, %v1182_v34  ;;  %v1286_v59 = vrot.slane %v1285_v52, 1 }
 0x138   : > { %1013 = vst.msk [vmem:[%s263_s11] sm:$0x1] %vm1012_vm4, %v1011_v55  ;;  %v1114_v29 = vadd.f32 %v1113_v56, %v1112_v41 }
 0x139   : > { %1186 = vst.msk [vmem:[%s2484_s14] sm:$0x1] %vm1185_vm5, %v1184_v42  ;;  %v1287_v30 = vadd.f32 %v1286_v59, %v1285_v52 }
 0x13a   : > { %1115 = vst.msk [vmem:[%s263_s11 + $0x1] sm:$0x1] %vm1012_vm4, %v1114_v29 }
 0x13b   : > { %1787 = shalt.err (!%p1784_p3)
}
 0x13c   : > { %s1788_s13 = scalar_lea.hbm %s2491_s18, 32  ;;  %s1792_s19 = scalar_lea.hbm %s2573_s5, 64 }
 0x13d   : > { %p1789_p4 = scmp.ne.s32.totalorder %s2491_s18, %s1788_s13  ;;  %p1793_p9 = scmp.lt.s32.totalorder %s2491_s18, %s2573_s5 }
 0x13e   : > { %p1794_p10 = scmp.lt.s32.totalorder %s1792_s19, %s1788_s13 }
 0x13f   : > { %p1790_p7 = pnand %p1789_p4, %p1938_p5 }
 0x140   : > { %p1795_p11 = por %p1794_p10, %p1793_p9 }
 0x141   : > { %p1791_p8 = pneg %p1790_p7 }
 0x143   : > { %p1796_p12 = pnand %p1795_p11, %p1791_p8 }
 0x145   : > { %1799 = shalt.err (!%p1796_p12)
}
 0x146   : > { %1730 = dma.vmem_to_hbm [thread:$0]  (%p1938_p5), %s2494_s12, 32, %s2491_s18, %s1300_s26   ;;  %1288 = vst.msk [vmem:[%s2484_s14 + $0x1] sm:$0x1] %vm1185_vm5, %v1287_v30 }
 0x147   : > { %s1305_s28 = scalar_lea.sflag [#allocation5], %s2481_s9  ;;  %s1800_s10 = scalar_lea.vmem %s2504_s15, 32 }
 0x148   : > { %p1801_p13 = scmp.ne.s32.totalorder %s2504_s15, %s1800_s10  ;;  %s1867_s16 = smov [#allocation4]  }
 0x149   : > { %s1804_s13 = sshll.u32 %s1867_s16, 4  ;;  %s1805_s13 = int_to_ptr.vmem [resolvable:$false] %s1804_s13 }
 0x14a   : > { %p1802_p0 = pnand %p1801_p13, %p1938_p5  ;;  %s1806_s11 = scalar_lea.vmem %s1805_s13, 64 }
 0x14b   : > { %p1807_p2 = scmp.lt.s32.totalorder %s2504_s15, %s1805_s13  ;;  %p1808_p3 = scmp.lt.s32.totalorder %s1806_s11, %s1800_s10 }
 0x14c   : > { %p1803_p1 = pneg %p1802_p0 }
 0x14d   : > { %p1809_p4 = por %p1808_p3, %p1807_p2 }
 0x14f   : > { %p1810_p7 = pnand %p1809_p4, %p1803_p1 }
 0x151   : > { %1813 = shalt.err (!%p1810_p7)
}
 0x152   : > { %s1814_s12 = scalar_lea.hbm %s2502_s25, 32  ;;  %s1818_s18 = scalar_lea.hbm %s2574_s6, 64 }
 0x153   : > { %p1815_p8 = scmp.ne.s32.totalorder %s2502_s25, %s1814_s12  ;;  %p1819_p11 = scmp.lt.s32.totalorder %s2502_s25, %s2574_s6 }
 0x154   : > { %p1820_p12 = scmp.lt.s32.totalorder %s1818_s18, %s1814_s12 }
 0x155   : > { %p1816_p9 = pnand %p1815_p8, %p1938_p5 }
 0x156   : > { %p1821_p13 = por %p1820_p12, %p1819_p11 }
 0x157   : > { %p1817_p10 = pneg %p1816_p9 }
 0x159   : > { %p1822_p0 = pnand %p1821_p13, %p1817_p10 }
 0x15b   : > { %1825 = shalt.err (!%p1822_p0)
}
 0x15c   : > { %1731 = dma.vmem_to_hbm [thread:$0]  (%p1938_p5), %s2504_s15, 32, %s2502_s25, %s1305_s28  }
 0x15d PF: > { %p1741_p1 = scmp.ge.s32.totalorder %s1864_s24, 2  ;;  %s1367_s19 = sand.u32 1, %s1852_s21  }
 0x15e   : > { %s1368_s20 = scalar_lea.sflag [#allocation3], %s1367_s19 }
 0x15f   : > { %p1735_p2 = pnand %p1741_p1, %p1942_p6 }
 0x161   : > { %p1736_p3 = pneg %p1735_p2 }
 0x163   : > { %1843 = dma.done.wait (%p1736_p3), %s1368_s20, 32  }
 0x164   : > { %1845 = vsyncadd (%p1736_p3), %s1368_s20, 4294967264  ;;  %s1377_s29 = scalar_lea.sflag [#allocation5], %s1367_s19 }
 0x165   : > { %1847 = dma.done.wait (%p1736_p3), %s1377_s29, 32  }
 0x166   : > { %1849 = vsyncadd (%p1736_p3), %s1377_s29, 4294967264  ;;  %p20_p5 = scmp.ge.s32.totalorder %s1926_s27, 4   ;;  %s2577_s21 = smov %s1856_s22 }
 0x167   : > { %s2578_s22 = smov %s1860_s23  ;;  %s2579_s23 = smov %s1936_s30 }
 0x168   : > { %s2580_s24 = smov %s1926_s27  ;;  %22 = sbr.rel (!%p20_p5) target bundleno = 5 (0x5), region = 108 }
 0x16d   :  { %1382 = vsyncpa [#allocation3], 1 }
 0x16e   :  { %1384 = vsyncpa [#allocation3 + $0x1], 1 }
 0x16f   :  { %1385 = vsyncpa [#allocation5], 1 }
 0x170   :  { %1387 = vsyncpa [#allocation5 + $0x1], 1 }

</bundles_post_ra>
